<compile_context>
chip_gen: v6e
topology: v6e:2x2x1
jax: 0.10.0
libtpu: 0.0.40
codegen_flags: <defaults>
</compile_context>

<pallas_src>
import functools
import math

import jax
import jax.numpy as jnp
from jax.experimental import pallas as pl
from jax.experimental.pallas import tpu as pltpu


def _round_up(x, m):
    return ((x + m - 1) // m) * m


def _device_kind():
    try:
        return jax.devices()[0].device_kind.lower()
    except Exception:
        return ""


def _timestep_embedder_kernel(t_ref, freqs_ref, w1_ref, b1_ref, w2_ref, b2_ref, o_ref,
                              *, half, fuse_first_dot):
    # Elementwise math stays in f32 (portable across v5e/v6e/v7x VPU/EUP).
    t = t_ref[...]                           # (TILE_N, 1)       f32
    freqs = freqs_ref[...]                   # (1, half)         f32
    args = t * freqs                         # (TILE_N, half)    f32

    mxu_dtype = w2_ref.dtype                 # bf16 (or f32) MXU operands
    cos_e = jnp.cos(args).astype(mxu_dtype)
    sin_e = jnp.sin(args).astype(mxu_dtype)

    if fuse_first_dot:
        # Single K = 2*half contraction: the cos/sin concat lands on a 128-lane boundary
        # (half == 128 for the default embedding size), so no cross-lane movement, and it
        # fills the 256-deep MXU on v6e/v7x in one pass.
        emb = jnp.concatenate([cos_e, sin_e], axis=-1)           # (TILE_N, 2*half)
        h = jnp.dot(emb, w1_ref[...], preferred_element_type=jnp.float32)
    else:
        # Split-K form: two full 128-deep passes for the v5-generation MXU.
        h = jnp.dot(cos_e, w1_ref[:half, :], preferred_element_type=jnp.float32)
        h = h + jnp.dot(sin_e, w1_ref[half:, :], preferred_element_type=jnp.float32)
    h = h + b1_ref[...]                      # (TILE_N, H) f32

    # SiLU: h * sigmoid(h); the divide runs on the EUP via approx reciprocal.  Clamp the
    # exp argument so strongly negative h cannot push exp -> inf (and NaN via the product).
    sig = pl.reciprocal(1.0 + jnp.exp(jnp.minimum(-h, 80.0)), approx=True)
    h = h * sig

    out = jnp.dot(h.astype(mxu_dtype), w2_ref[...], preferred_element_type=jnp.float32)
    out = out + b2_ref[...]
    o_ref[...] = out.astype(o_ref.dtype)


def timestep_embedder(t, params, frequency_embedding_size=256, max_period=10000,
                      compute_dtype=jnp.bfloat16, out_dtype=jnp.float32,
                      max_tile_n=256, fuse_first_dot=None):
    """Forward pass of TimestepEmbedder. t: (N,) float. Returns (N, hidden) in out_dtype."""
    w1, b1, w2, b2 = params["w1"], params["b1"], params["w2"], params["b2"]
    hidden = w2.shape[-1]
    n = t.shape[0]
    half = frequency_embedding_size // 2
    two_half = 2 * half

    kind = _device_kind()
    if fuse_first_dot is None:
        # 256-deep MXU (v6e / v7x): fuse. 128-deep MXU (v2-v5): keep split K=half dots.
        fuse_first_dot = not any(f"v{g}" in kind for g in (2, 3, 4, 5))

    # If frequency_embedding_size is odd, the reference zero-pads the embedding; that zero
    # column multiplies the last row of w1, so dropping that row is equivalent.
    w1f = w1[:two_half].astype(compute_dtype)           # (2*half, H)
    w2c = w2.astype(compute_dtype)                      # (H, H)
    b1f = b1.reshape(1, hidden).astype(jnp.float32)
    b2f = b2.reshape(1, hidden).astype(jnp.float32)

    freqs = jnp.exp(
        -math.log(max_period) * jnp.arange(0, half, dtype=jnp.float32) / half
    ).reshape(1, half)

    # Row tiling: cap tiles at max_tile_n so large N yields several pipelined steps, and
    # force >= 2 grid steps once N >= 16 so both v7x TensorCores get work.
    n_pad8 = _round_up(max(n, 1), 8)
    tile_n = min(_round_up(max_tile_n, 8), n_pad8)
    if n_pad8 >= 16:
        tile_n = min(tile_n, _round_up(pl.cdiv(n_pad8, 2), 8))
    n_pad = _round_up(n_pad8, tile_n)
    grid = (n_pad // tile_n,)

    t2d = jnp.zeros((n_pad, 1), jnp.float32).at[:n, 0].set(t.astype(jnp.float32))

    w_itemsize = jnp.dtype(compute_dtype).itemsize
    out_itemsize = jnp.dtype(out_dtype).itemsize
    weight_bytes = (two_half * hidden + hidden * hidden) * w_itemsize
    aux_bytes = (2 * hidden + half) * 4                            # biases + freqs (f32)
    io_bytes = 2 * 2 * tile_n * (4 + hidden * out_itemsize)        # double-buffered t/out tiles
    scratch_bytes = 4 * tile_n * max(two_half, hidden) * 4         # in-kernel intermediates
    vmem_cap = (56 if "v7" in kind else 96) * 1024 * 1024          # stay under physical VMEM

    ce = pl.CostEstimate(
        flops=int(2 * n_pad * hidden * (two_half + hidden) + 8 * n_pad * hidden),
        transcendentals=int(n_pad * (two_half + 2 * hidden)),
        bytes_accessed=int(weight_bytes + aux_bytes + n_pad * (4 + hidden * out_itemsize)),
    )

    kernel = functools.partial(_timestep_embedder_kernel, half=half,
                               fuse_first_dot=fuse_first_dot)

    def run(weight_pipeline_mode):
        spec_kw = {}
        weight_buffers = 2
        if weight_pipeline_mode is not None:
            spec_kw = {"pipeline_mode": weight_pipeline_mode}
            weight_buffers = 1
        vmem_est = weight_buffers * (weight_bytes + aux_bytes) + io_bytes + scratch_bytes
        compiler_kwargs = dict(dimension_semantics=("parallel",))
        if vmem_est > 12 * 1024 * 1024:
            compiler_kwargs["vmem_limit_bytes"] = min(int(vmem_est * 3 // 2), vmem_cap)
        in_specs = [
            pl.BlockSpec((tile_n, 1), lambda i: (i, 0)),                    # t    (tiled rows)
            pl.BlockSpec((1, half), lambda i: (0, 0), **spec_kw),           # freqs (resident)
            pl.BlockSpec((two_half, hidden), lambda i: (0, 0), **spec_kw),  # w1    (resident)
            pl.BlockSpec((1, hidden), lambda i: (0, 0), **spec_kw),         # b1    (resident)
            pl.BlockSpec((hidden, hidden), lambda i: (0, 0), **spec_kw),    # w2    (resident)
            pl.BlockSpec((1, hidden), lambda i: (0, 0), **spec_kw),         # b2    (resident)
        ]
        return pl.pallas_call(
            kernel,
            out_shape=jax.ShapeDtypeStruct((n_pad, hidden), out_dtype),
            grid=grid,
            in_specs=in_specs,
            out_specs=pl.BlockSpec((tile_n, hidden), lambda i: (i, 0)),
            compiler_params=pltpu.CompilerParams(**compiler_kwargs),
            cost_estimate=ce,
        )(t2d, freqs, w1f, b1f, w2c, b2f)

    try:
        # Grid-invariant operands single-buffered: no overlap benefit, half the VMEM.
        out = run(pl.Buffered(1))
    except Exception:
        # Fallback: default double-buffering (correctness identical, just more VMEM).
        out = run(None)

    return out[:n]


def init_params(key, hidden_size, frequency_embedding_size=256):
    """Deterministic synthetic parameters matching nn.Linear shapes (stored transposed)."""
    k1, k2, k3, k4 = jax.random.split(key, 4)
    # PyTorch: Linear(F, H).weight is (H, F); we store (F, H) so the kernel does x @ w.
    w1 = jax.random.normal(k1, (frequency_embedding_size, hidden_size), jnp.float32) * 0.02
    b1 = jax.random.normal(k2, (1, hidden_size), jnp.float32) * 0.02
    w2 = jax.random.normal(k3, (hidden_size, hidden_size), jnp.float32) * 0.02
    b2 = jax.random.normal(k4, (1, hidden_size), jnp.float32) * 0.02
    return {"w1": w1, "b1": b1, "w2": w2, "b2": b2}


def _reference(t, params, frequency_embedding_size=256, max_period=10000):
    """Pure-JAX reference mirroring the PyTorch module, for correctness checks."""
    half = frequency_embedding_size // 2
    freqs = jnp.exp(-math.log(max_period) * jnp.arange(0, half, dtype=jnp.float32) / half)
    args = t.astype(jnp.float32)[:, None] * freqs[None]
    emb = jnp.concatenate([jnp.cos(args), jnp.sin(args)], axis=-1)
    h = emb @ params["w1"] + params["b1"]
    h = h * jax.nn.sigmoid(h)
    return h @ params["w2"] + params["b2"]


if __name__ == "__main__":
    N = 8               # batch of timesteps
    HIDDEN = 128        # hidden_size (lane-aligned)
    FREQ = 256          # frequency_embedding_size (module default)

    key = jax.random.PRNGKey(0)
    k_t, k_p = jax.random.split(key)
    t = jax.random.uniform(k_t, (N,), jnp.float32, minval=0.0, maxval=1000.0)
    params = init_params(k_p, HIDDEN, FREQ)
    ref = _reference(t, params, FREQ)

    # 1) f32 MXU operands: structural / numerics check vs the pure-JAX reference.
    out_f32 = jax.block_until_ready(
        timestep_embedder(t, params, FREQ, compute_dtype=jnp.float32))
    assert out_f32.shape == (N, HIDDEN)
    assert jnp.allclose(out_f32, ref, atol=5e-3, rtol=5e-3), "f32 mismatch vs reference"

    # 2) bf16 MXU operands (default perf path): looser tolerance.
    out_bf16 = jax.block_until_ready(timestep_embedder(t, params, FREQ))
    assert out_bf16.shape == (N, HIDDEN)
    assert jnp.allclose(out_bf16, ref, atol=2e-2, rtol=2e-2), "bf16 mismatch vs reference"

    # 3) Multi-step grid (N=32 -> >= 2 grid steps): exercises resident single-buffered weights.
    t32 = jax.random.uniform(jax.random.PRNGKey(2), (32,), jnp.float32,
                             minval=0.0, maxval=1000.0)
    out32 = jax.block_until_ready(
        timestep_embedder(t32, params, FREQ, compute_dtype=jnp.float32))
    ref32 = _reference(t32, params, FREQ)
    assert out32.shape == (32, HIDDEN)
    assert jnp.allclose(out32, ref32, atol=5e-3, rtol=5e-3), "multi-step grid mismatch"

    # 4) N not a multiple of the row tile: exercises the padding path.
    t_odd = jax.random.uniform(jax.random.PRNGKey(1), (13,), jnp.float32,
                               minval=0.0, maxval=1000.0)
    out_odd = jax.block_until_ready(
        timestep_embedder(t_odd, params, FREQ, compute_dtype=jnp.float32))
    ref_odd = _reference(t_odd, params, FREQ)
    assert out_odd.shape == (13, HIDDEN)
    assert jnp.allclose(out_odd, ref_odd, atol=5e-3, rtol=5e-3), "padded-N mismatch"

    # 5) bf16 output (memory-bound win when the consumer accepts it): loose tolerance.
    out_lo = jax.block_until_ready(
        timestep_embedder(t, params, FREQ, out_dtype=jnp.bfloat16))
    assert out_lo.dtype == jnp.bfloat16
    assert jnp.allclose(out_lo.astype(jnp.float32), ref, atol=5e-2, rtol=5e-2), \
        "bf16-output mismatch vs reference"

    print("KERNEL_OK")
</pallas_src>

<mosaic_0001>
module attributes {stable_mosaic.version = 11 : i64} {
  func.func @_timestep_embedder_kernel(%arg0: i32, %arg1: memref<8x1xf32, #tpu.memory_space<vmem>>, %arg2: memref<1x128xf32, #tpu.memory_space<vmem>>, %arg3: memref<256x128xf32, #tpu.memory_space<vmem>>, %arg4: memref<1x128xf32, #tpu.memory_space<vmem>>, %arg5: memref<128x128xf32, #tpu.memory_space<vmem>>, %arg6: memref<1x128xf32, #tpu.memory_space<vmem>>, %arg7: memref<8x128xf32, #tpu.memory_space<vmem>>) attributes {dimension_semantics = [#tpu.dimension_semantics<parallel>], iteration_bounds = array<i64: 1>, scalar_prefetch = 0 : i64, scratch_operands = 0 : i64, tpu.core_type = #tpu.core_type<tc>, window_params = [{transform_indices = @transform_0, window_bounds = array<i64: 8, 1>}, {pipeline_mode = #tpu.pipeline_mode<synchronous>, transform_indices = @transform_1, window_bounds = array<i64: 1, 128>}, {pipeline_mode = #tpu.pipeline_mode<synchronous>, transform_indices = @transform_2, window_bounds = array<i64: 256, 128>}, {pipeline_mode = #tpu.pipeline_mode<synchronous>, transform_indices = @transform_3, window_bounds = array<i64: 1, 128>}, {pipeline_mode = #tpu.pipeline_mode<synchronous>, transform_indices = @transform_4, window_bounds = array<i64: 128, 128>}, {pipeline_mode = #tpu.pipeline_mode<synchronous>, transform_indices = @transform_5, window_bounds = array<i64: 1, 128>}, {transform_indices = @transform_6, window_bounds = array<i64: 8, 128>}]} {
    %c0 = arith.constant 0 : index
    %c0_0 = arith.constant 0 : index
    %0 = vector.load %arg1[%c0, %c0_0] : memref<8x1xf32, #tpu.memory_space<vmem>>, vector<8x1xf32>
    %c0_1 = arith.constant 0 : index
    %c0_2 = arith.constant 0 : index
    %1 = vector.load %arg2[%c0_1, %c0_2] : memref<1x128xf32, #tpu.memory_space<vmem>>, vector<1x128xf32>
    %2 = vector.broadcast %0 : vector<8x1xf32> to vector<8x128xf32>
    %3 = vector.broadcast %1 : vector<1x128xf32> to vector<8x128xf32>
    %4 = arith.mulf %2, %3 : vector<8x128xf32>
    %5 = math.cos %4 : vector<8x128xf32>
    %6 = math.sin %4 : vector<8x128xf32>
    %7 = tpu.concatenate %5, %6 in 1 : vector<8x128xf32>, vector<8x128xf32> -> vector<8x256xf32>
    %c0_3 = arith.constant 0 : index
    %c0_4 = arith.constant 0 : index
    %8 = vector.load %arg3[%c0_3, %c0_4] : memref<256x128xf32, #tpu.memory_space<vmem>>, vector<256x128xf32>
    %cst = arith.constant dense<0.000000e+00> : vector<8x128xf32>
    %9 = tpu.matmul %7, %8, %cst {dimension_numbers = #tpu.dot_dimension_numbers<[1], [0], [0], [1], [0, 0, 1, 1], [], []>} : vector<8x256xf32>, vector<256x128xf32>, vector<8x128xf32> -> vector<8x128xf32>
    %c0_5 = arith.constant 0 : index
    %c0_6 = arith.constant 0 : index
    %10 = vector.load %arg4[%c0_5, %c0_6] : memref<1x128xf32, #tpu.memory_space<vmem>>, vector<1x128xf32>
    %11 = vector.broadcast %10 : vector<1x128xf32> to vector<8x128xf32>
    %12 = arith.addf %9, %11 : vector<8x128xf32>
    %cst_7 = arith.constant 0.000000e+00 : f32
    %13 = vector.broadcast %cst_7 : f32 to vector<8x128xf32>
    %14 = arith.subf %13, %12 : vector<8x128xf32>
    %cst_8 = arith.constant 8.000000e+01 : f32
    %15 = vector.broadcast %cst_8 : f32 to vector<8x128xf32>
    %16 = arith.minimumf %14, %15 : vector<8x128xf32>
    %17 = math.exp %16 : vector<8x128xf32>
    %cst_9 = arith.constant 1.000000e+00 : f32
    %18 = vector.broadcast %cst_9 : f32 to vector<8x128xf32>
    %19 = arith.addf %18, %17 : vector<8x128xf32>
    %20 = tpu.reciprocal %19 {approx = true} : vector<8x128xf32> -> vector<8x128xf32>
    %21 = arith.mulf %12, %20 : vector<8x128xf32>
    %c0_10 = arith.constant 0 : index
    %c0_11 = arith.constant 0 : index
    %22 = vector.load %arg5[%c0_10, %c0_11] : memref<128x128xf32, #tpu.memory_space<vmem>>, vector<128x128xf32>
    %cst_12 = arith.constant dense<0.000000e+00> : vector<8x128xf32>
    %23 = tpu.matmul %21, %22, %cst_12 {dimension_numbers = #tpu.dot_dimension_numbers<[1], [0], [0], [1], [0, 0, 1, 1], [], []>} : vector<8x128xf32>, vector<128x128xf32>, vector<8x128xf32> -> vector<8x128xf32>
    %c0_13 = arith.constant 0 : index
    %c0_14 = arith.constant 0 : index
    %24 = vector.load %arg6[%c0_13, %c0_14] : memref<1x128xf32, #tpu.memory_space<vmem>>, vector<1x128xf32>
    %25 = vector.broadcast %24 : vector<1x128xf32> to vector<8x128xf32>
    %26 = arith.addf %23, %25 : vector<8x128xf32>
    %c0_15 = arith.constant 0 : index
    %c0_16 = arith.constant 0 : index
    %27 = vector.load %arg7[%c0_15, %c0_16] : memref<8x128xf32, #tpu.memory_space<vmem>>, vector<8x128xf32>
    tpu.vector_store %arg7[%c0_15, %c0_16], %26 {strides = array<i32>} : memref<8x128xf32, #tpu.memory_space<vmem>>, vector<8x128xf32>,
    return
  }
  func.func @transform_0(%arg0: i32) -> (i32, i32) {
    %c0_i32 = arith.constant 0 : i32
    %c0_i32_0 = arith.constant 0 : i32
    return %arg0, %c0_i32 : i32, i32
  }
  func.func @transform_1(%arg0: i32) -> (i32, i32) {
    %c0_i32 = arith.constant 0 : i32
    %c0_i32_0 = arith.constant 0 : i32
    %c0_i32_1 = arith.constant 0 : i32
    return %c0_i32, %c0_i32_0 : i32, i32
  }
  func.func @transform_2(%arg0: i32) -> (i32, i32) {
    %c0_i32 = arith.constant 0 : i32
    %c0_i32_0 = arith.constant 0 : i32
    %c0_i32_1 = arith.constant 0 : i32
    return %c0_i32, %c0_i32_0 : i32, i32
  }
  func.func @transform_3(%arg0: i32) -> (i32, i32) {
    %c0_i32 = arith.constant 0 : i32
    %c0_i32_0 = arith.constant 0 : i32
    %c0_i32_1 = arith.constant 0 : i32
    return %c0_i32, %c0_i32_0 : i32, i32
  }
  func.func @transform_4(%arg0: i32) -> (i32, i32) {
    %c0_i32 = arith.constant 0 : i32
    %c0_i32_0 = arith.constant 0 : i32
    %c0_i32_1 = arith.constant 0 : i32
    return %c0_i32, %c0_i32_0 : i32, i32
  }
  func.func @transform_5(%arg0: i32) -> (i32, i32) {
    %c0_i32 = arith.constant 0 : i32
    %c0_i32_0 = arith.constant 0 : i32
    %c0_i32_1 = arith.constant 0 : i32
    return %c0_i32, %c0_i32_0 : i32, i32
  }
  func.func @transform_6(%arg0: i32) -> (i32, i32) {
    %c0_i32 = arith.constant 0 : i32
    %c0_i32_0 = arith.constant 0 : i32
    return %arg0, %c0_i32 : i32, i32
  }
}

module attributes {stable_mosaic.version = 11 : i64} {
  func.func @_timestep_embedder_kernel(%arg0: i32, %arg1: memref<8x1xf32, #tpu.memory_space<vmem>>, %arg2: memref<1x128xf32, #tpu.memory_space<vmem>>, %arg3: memref<256x128xf32, #tpu.memory_space<vmem>>, %arg4: memref<1x128xf32, #tpu.memory_space<vmem>>, %arg5: memref<128x128xf32, #tpu.memory_space<vmem>>, %arg6: memref<1x128xf32, #tpu.memory_space<vmem>>, %arg7: memref<8x128xf32, #tpu.memory_space<vmem>>) attributes {dimension_semantics = [#tpu.dimension_semantics<parallel>], iteration_bounds = array<i64: 1>, scalar_prefetch = 0 : i64, scratch_operands = 0 : i64, tpu.core_type = #tpu.core_type<tc>, window_params = [{transform_indices = @transform_0, window_bounds = array<i64: 8, 1>}, {pipeline_mode = #tpu.pipeline_mode<synchronous>, transform_indices = @transform_1, window_bounds = array<i64: 1, 128>}, {pipeline_mode = #tpu.pipeline_mode<synchronous>, transform_indices = @transform_2, window_bounds = array<i64: 256, 128>}, {pipeline_mode = #tpu.pipeline_mode<synchronous>, transform_indices = @transform_3, window_bounds = array<i64: 1, 128>}, {pipeline_mode = #tpu.pipeline_mode<synchronous>, transform_indices = @transform_4, window_bounds = array<i64: 128, 128>}, {pipeline_mode = #tpu.pipeline_mode<synchronous>, transform_indices = @transform_5, window_bounds = array<i64: 1, 128>}, {transform_indices = @transform_6, window_bounds = array<i64: 8, 128>}]} {
    %c0 = arith.constant 0 : index
    %c0_0 = arith.constant 0 : index
    %0 = vector.load %arg1[%c0, %c0_0] : memref<8x1xf32, #tpu.memory_space<vmem>>, vector<8x1xf32>
    %c0_1 = arith.constant 0 : index
    %c0_2 = arith.constant 0 : index
    %1 = vector.load %arg2[%c0_1, %c0_2] : memref<1x128xf32, #tpu.memory_space<vmem>>, vector<1x128xf32>
    %2 = vector.broadcast %0 : vector<8x1xf32> to vector<8x128xf32>
    %3 = vector.broadcast %1 : vector<1x128xf32> to vector<8x128xf32>
    %4 = arith.mulf %2, %3 : vector<8x128xf32>
    %5 = math.cos %4 : vector<8x128xf32>
    %6 = math.sin %4 : vector<8x128xf32>
    %7 = tpu.concatenate %5, %6 in 1 : vector<8x128xf32>, vector<8x128xf32> -> vector<8x256xf32>
    %c0_3 = arith.constant 0 : index
    %c0_4 = arith.constant 0 : index
    %8 = vector.load %arg3[%c0_3, %c0_4] : memref<256x128xf32, #tpu.memory_space<vmem>>, vector<256x128xf32>
    %cst = arith.constant dense<0.000000e+00> : vector<8x128xf32>
    %9 = tpu.matmul %7, %8, %cst {dimension_numbers = #tpu.dot_dimension_numbers<[1], [0], [0], [1], [0, 0, 1, 1], [], []>} : vector<8x256xf32>, vector<256x128xf32>, vector<8x128xf32> -> vector<8x128xf32>
    %c0_5 = arith.constant 0 : index
    %c0_6 = arith.constant 0 : index
    %10 = vector.load %arg4[%c0_5, %c0_6] : memref<1x128xf32, #tpu.memory_space<vmem>>, vector<1x128xf32>
    %11 = vector.broadcast %10 : vector<1x128xf32> to vector<8x128xf32>
    %12 = arith.addf %9, %11 : vector<8x128xf32>
    %cst_7 = arith.constant 0.000000e+00 : f32
    %13 = vector.broadcast %cst_7 : f32 to vector<8x128xf32>
    %14 = arith.subf %13, %12 : vector<8x128xf32>
    %cst_8 = arith.constant 8.000000e+01 : f32
    %15 = vector.broadcast %cst_8 : f32 to vector<8x128xf32>
    %16 = arith.minimumf %14, %15 : vector<8x128xf32>
    %17 = math.exp %16 : vector<8x128xf32>
    %cst_9 = arith.constant 1.000000e+00 : f32
    %18 = vector.broadcast %cst_9 : f32 to vector<8x128xf32>
    %19 = arith.addf %18, %17 : vector<8x128xf32>
    %20 = tpu.reciprocal %19 {approx = true} : vector<8x128xf32> -> vector<8x128xf32>
    %21 = arith.mulf %12, %20 : vector<8x128xf32>
    %c0_10 = arith.constant 0 : index
    %c0_11 = arith.constant 0 : index
    %22 = vector.load %arg5[%c0_10, %c0_11] : memref<128x128xf32, #tpu.memory_space<vmem>>, vector<128x128xf32>
    %cst_12 = arith.constant dense<0.000000e+00> : vector<8x128xf32>
    %23 = tpu.matmul %21, %22, %cst_12 {dimension_numbers = #tpu.dot_dimension_numbers<[1], [0], [0], [1], [0, 0, 1, 1], [], []>} : vector<8x128xf32>, vector<128x128xf32>, vector<8x128xf32> -> vector<8x128xf32>
    %c0_13 = arith.constant 0 : index
    %c0_14 = arith.constant 0 : index
    %24 = vector.load %arg6[%c0_13, %c0_14] : memref<1x128xf32, #tpu.memory_space<vmem>>, vector<1x128xf32>
    %25 = vector.broadcast %24 : vector<1x128xf32> to vector<8x128xf32>
    %26 = arith.addf %23, %25 : vector<8x128xf32>
    %c0_15 = arith.constant 0 : index
    %c0_16 = arith.constant 0 : index
    %27 = vector.load %arg7[%c0_15, %c0_16] : memref<8x128xf32, #tpu.memory_space<vmem>>, vector<8x128xf32>
    tpu.vector_store %arg7[%c0_15, %c0_16], %26 {strides = array<i32>} : memref<8x128xf32, #tpu.memory_space<vmem>>, vector<8x128xf32>,
    return
  }
  func.func @transform_0(%arg0: i32) -> (i32, i32) {
    %c0_i32 = arith.constant 0 : i32
    %c0_i32_0 = arith.constant 0 : i32
    return %arg0, %c0_i32 : i32, i32
  }
  func.func @transform_1(%arg0: i32) -> (i32, i32) {
    %c0_i32 = arith.constant 0 : i32
    %c0_i32_0 = arith.constant 0 : i32
    %c0_i32_1 = arith.constant 0 : i32
    return %c0_i32, %c0_i32_0 : i32, i32
  }
  func.func @transform_2(%arg0: i32) -> (i32, i32) {
    %c0_i32 = arith.constant 0 : i32
    %c0_i32_0 = arith.constant 0 : i32
    %c0_i32_1 = arith.constant 0 : i32
    return %c0_i32, %c0_i32_0 : i32, i32
  }
  func.func @transform_3(%arg0: i32) -> (i32, i32) {
    %c0_i32 = arith.constant 0 : i32
    %c0_i32_0 = arith.constant 0 : i32
    %c0_i32_1 = arith.constant 0 : i32
    return %c0_i32, %c0_i32_0 : i32, i32
  }
  func.func @transform_4(%arg0: i32) -> (i32, i32) {
    %c0_i32 = arith.constant 0 : i32
    %c0_i32_0 = arith.constant 0 : i32
    %c0_i32_1 = arith.constant 0 : i32
    return %c0_i32, %c0_i32_0 : i32, i32
  }
  func.func @transform_5(%arg0: i32) -> (i32, i32) {
    %c0_i32 = arith.constant 0 : i32
    %c0_i32_0 = arith.constant 0 : i32
    %c0_i32_1 = arith.constant 0 : i32
    return %c0_i32, %c0_i32_0 : i32, i32
  }
  func.func @transform_6(%arg0: i32) -> (i32, i32) {
    %c0_i32 = arith.constant 0 : i32
    %c0_i32_0 = arith.constant 0 : i32
    return %arg0, %c0_i32 : i32, i32
  }
}

</mosaic_0001>

<bundles_post_ra>
// kernel: tpu_custom_call.1
= control target key start
LH: loop header
LB: loop body
LE: loop exit
PB: predicated region body
PF: predicated region fallthrough
CT: control target
= control target key end

     0   :  { %11 = vsyncpa [#allocation3], 0  ;;  %s781_s0 = inlined_call_operand.vmem [shape: f32[8,1], index: 0, kind: input, shape index: {}]   ;;  %s782_s1 = inlined_call_operand.vmem [shape: f32[1,128], index: 1, kind: input, shape index: {}]   ;;  %s783_s2 = inlined_call_operand.hbm [shape: f32[256,128], index: 2, kind: input, shape index: {}]   ;;  %s784_s3 = inlined_call_operand.vmem [shape: f32[1,128], index: 3, kind: input, shape index: {}]   ;;  %s785_s4 = inlined_call_operand.hbm [shape: f32[128,128], index: 4, kind: input, shape index: {}]   ;;  %s786_s5 = inlined_call_operand.vmem [shape: f32[1,128], index: 5, kind: input, shape index: {}]   ;;  %s787_s6 = inlined_call_operand.hbm [shape: f32[8,128], index: 6, kind: output, shape index: {}]  }
   0x1   :  { %12 = vsyncpa [#allocation6], 0 }
   0x2   :  { %13 = vsyncpa [#allocation4], 0  ;;  %s690_s21 = smov [#allocation2]  }
   0x3   :  { %s23_s22 = sshll.u32 %s690_s21, 4  ;;  %s24_s22 = int_to_ptr.vmem [resolvable:$true] %s23_s22 }
   0x4   :  { %s632_s23 = scalar_lea.vmem %s24_s22, 4096  ;;  %p637_p1 = scmp.lt.s32.totalorder %s24_s22, %s24_s22 }
   0x5   :  { %p633_p0 = scmp.ne.s32.totalorder %s24_s22, %s632_s23  ;;  %p638_p2 = scmp.lt.s32.totalorder %s632_s23, %s632_s23 }
   0x7   :  { %p639_p3 = por %p638_p2, %p637_p1 }
   0x9   :  { %p640_p4 = pnand %p639_p3, %p633_p0 }
   0xb   :  { %643 = shalt.err (!%p640_p4)
}
   0xc   :  { %s691_s24 = smov 128   ;;  %s692_s25 = smov 8  }
   0xd   :  { %29 = dma.hbm_to_vmem [thread:$0]  %s783_s2, 4096, %s24_s22, [#allocation3], %s691_s24, %s691_s24, %s692_s25  }
   0xe   :  { %s693_s28 = smov [#allocation5]  }
   0xf   :  { %s37_s29 = sshll.u32 %s693_s28, 4  ;;  %s38_s29 = int_to_ptr.vmem [resolvable:$true] %s37_s29 }
  0x10   :  { %s652_s30 = scalar_lea.vmem %s38_s29, 2048  ;;  %p657_p6 = scmp.lt.s32.totalorder %s38_s29, %s38_s29 }
  0x11   :  { %p653_p5 = scmp.ne.s32.totalorder %s38_s29, %s652_s30  ;;  %p658_p7 = scmp.lt.s32.totalorder %s652_s30, %s652_s30 }
  0x13   :  { %p659_p8 = por %p658_p7, %p657_p6 }
  0x15   :  { %p660_p9 = pnand %p659_p8, %p653_p5 }
  0x17   :  { %663 = shalt.err (!%p660_p9)
}
  0x18   :  { %43 = dma.hbm_to_vmem [thread:$0]  %s785_s4, 2048, %s38_s29, [#allocation6], %s691_s24, %s691_s24, %s692_s25  }
  0x19   :  { %684 = dma.done.wait [#allocation3], 4096  }
  0x1a   :  { %685 = vsyncadd [#allocation3], 4294963200 }
  0x1b   :  { %686 = dma.done.wait [#allocation6], 2048  }
  0x1c   :  { %687 = vsyncadd [#allocation6], 4294965248  ;;  %v694_v0 = vmov 0   ;;  %v52_v1 = vld [vmem:[%s781_s0] sm:$0xff]  ;;  %v304_v2 = vld [vmem:[#allocation2 + $0xf8] sm:$0xff]  ;;  %s703_s13 = smov [#allocation7]  }
  0x1d   :  { %615 = vset.pattern.permute.xlu0 %v694_v0  ;;  %v288_v3 = vld [vmem:[#allocation2 + $0x78] sm:$0xff]  ;;  %v303_v4 = vld [vmem:[#allocation2 + $0xf0] sm:$0xff]  ;;  %510 = vmatprep.subr.mxu0 %v304_v2  ;;  %v302_v6 = vld [vmem:[#allocation2 + $0xe8] sm:$0xff]  ;;  %v695_v48 = vmov 2102212464   ;;  %s489_s14 = sshll.u32 %s703_s13, 4  ;;  %s490_s14 = int_to_ptr.vmem [resolvable:$true] %s489_s14 }
  0x1e   :  { %56 = vperm.xlu0 %615, %v52_v1   ;;  %v287_v5 = vld [vmem:[#allocation2 + $0x70] sm:$0xff]  ;;  %511 = vmatpush3.msra.mxu0 %v288_v3  ;;  %v286_v7 = vld [vmem:[#allocation2 + $0x68] sm:$0xff]  ;;  %v301_v8 = vld [vmem:[#allocation2 + $0xe0] sm:$0xff]  ;;  %v696_v50 = vmov 920167782   ;;  %p669_p11 = scmp.lt.s32.totalorder %s490_s14, %s490_s14 }
  0x1f   :  { %512 = vmatprep.subr.mxu0 %v303_v4  ;;  %v285_v9 = vld [vmem:[#allocation2 + $0x60] sm:$0xff]  ;;  %v300_v10 = vld [vmem:[#allocation2 + $0xd8] sm:$0xff]  ;;  %v299_v12 = vld [vmem:[#allocation2 + $0xd0] sm:$0xff]  ;;  %v697_v54 = vmov 1326507024  }
  0x20   :  { %513 = vmatpush3.msra.mxu0 %v287_v5  ;;  %v284_v11 = vld [vmem:[#allocation2 + $0x58] sm:$0xff]  ;;  %v283_v13 = vld [vmem:[#allocation2 + $0x50] sm:$0xff]  ;;  %v298_v14 = vld [vmem:[#allocation2 + $0xc8] sm:$0xff]  ;;  %v698_v56 = vmov 683565275  }
  0x21   :  { %514 = vmatprep.subr.mxu0 %v302_v6  ;;  %v282_v15 = vld [vmem:[#allocation2 + $0x48] sm:$0xff]  ;;  %v297_v16 = vld [vmem:[#allocation2 + $0xc0] sm:$0xff]  ;;  %v296_v18 = vld [vmem:[#allocation2 + $0xb8] sm:$0xff]  ;;  %v699_v58 = vmov 2475754826  }
  0x22   :  { %515 = vmatpush3.msra.mxu0 %v286_v7  ;;  %v281_v17 = vld [vmem:[#allocation2 + $0x40] sm:$0xff]  ;;  %v280_v19 = vld [vmem:[#allocation2 + $0x38] sm:$0xff]  ;;  %v295_v20 = vld [vmem:[#allocation2 + $0xb0] sm:$0xff]  ;;  %v700_v61 = vmov 2131351028  }
  0x23   :  { %516 = vmatprep.subr.mxu0 %v301_v8  ;;  %v279_v21 = vld [vmem:[#allocation2 + $0x30] sm:$0xff]  ;;  %v294_v22 = vld [vmem:[#allocation2 + $0xa8] sm:$0xff]  ;;  %v293_v24 = vld [vmem:[#allocation2 + $0xa0] sm:$0xff] }
  0x24   :  { %517 = vmatpush3.msra.mxu0 %v285_v9  ;;  %v278_v23 = vld [vmem:[#allocation2 + $0x28] sm:$0xff]  ;;  %v277_v25 = vld [vmem:[#allocation2 + $0x20] sm:$0xff]  ;;  %v292_v26 = vld [vmem:[#allocation2 + $0x98] sm:$0xff] }
  0x25   :  { %518 = vmatprep.subr.mxu0 %v300_v10  ;;  %v276_v27 = vld [vmem:[#allocation2 + $0x18] sm:$0xff]  ;;  %v291_v28 = vld [vmem:[#allocation2 + $0x90] sm:$0xff]  ;;  %v290_v30 = vld [vmem:[#allocation2 + $0x88] sm:$0xff] }
  0x26   :  { %519 = vmatpush3.msra.mxu0 %v284_v11  ;;  %v275_v29 = vld [vmem:[#allocation2 + $0x10] sm:$0xff]  ;;  %v274_v31 = vld [vmem:[#allocation2 + $0x8] sm:$0xff]  ;;  %v289_v32 = vld [vmem:[#allocation2 + $0x80] sm:$0xff] }
  0x27   :  { %520 = vmatprep.subr.mxu0 %v299_v12  ;;  %v273_v33 = vld [vmem:[#allocation2] sm:$0xff] }
  0x28   :  { %521 = vmatpush3.msra.mxu0 %v283_v13  ;;  %v499_v34 = vld [vmem:[%s782_s1] ss:$0 sm:$0xff] }
  0x29   :  { %522 = vmatprep.subr.mxu0 %v298_v14 }
  0x2a   :  { %523 = vmatpush3.msra.mxu0 %v282_v15 }
  0x2b   :  { %524 = vmatprep.subr.mxu0 %v297_v16 }
  0x2c   :  { %525 = vmatpush3.msra.mxu0 %v281_v17 }
  0x2d   :  { %526 = vmatprep.subr.mxu0 %v296_v18 }
  0x2e   :  { %527 = vmatpush3.msra.mxu0 %v280_v19 }
  0x2f   :  { %528 = vmatprep.subr.mxu0 %v295_v20 }
  0x30   :  { %529 = vmatpush3.msra.mxu0 %v279_v21 }
  0x31   :  { %530 = vmatprep.subr.mxu0 %v294_v22 }
  0x32   :  { %531 = vmatpush3.msra.mxu0 %v278_v23 }
  0x33   :  { %532 = vmatprep.subr.mxu0 %v293_v24 }
  0x34   :  { %533 = vmatpush3.msra.mxu0 %v277_v25 }
  0x35   :  { %534 = vmatprep.subr.mxu0 %v292_v26 }
  0x36   :  { %535 = vmatpush3.msra.mxu0 %v276_v27 }
  0x37   :  { %536 = vmatprep.subr.mxu0 %v291_v28 }
  0x38   :  { %537 = vmatpush3.msra.mxu0 %v275_v29 }
  0x39   :  { %538 = vmatprep.subr.mxu0 %v290_v30 }
  0x3a   :  { %539 = vmatpush3.msra.mxu0 %v274_v31 }
  0x3b   :  { %540 = vmatprep.subr.mxu0 %v289_v32 }
  0x3c   :  { %541 = vmatpush3.msra.mxu0 %v273_v33 }
  0x99   :  { %v57_v35 = vpop.permute.xlu0 %56 }
  0x9a   :  { %v751_v36 = vmul.f32 %v499_v34, %v57_v35 }
  0x9c   :  { %v69_v37 = vand.u32 2139095040, %v751_v36  ;;  %v66_v38 = vand.u32 2147483647, %v751_v36  ;;  %vm68_vm7 = vcmp.lt.s32.totalorder %v751_v36, 0  ;;  %vm158_vm15 = vweird.f32 %v751_v36 }
  0x9e   :  { %v70_v39 = vshrl.u32 %v69_v37, 23  ;;  %v73_v41 = vand.u32 8388607, %v66_v38  ;;  %vm67_vm8 = vcmp.le.f32.partialorder %v66_v38, 0.7853982 }
  0xa0   :  { %v500_v40 = vadd.s32 4294967169, %v70_v39  ;;  %v74_v44 = vor.u32 8388608, %v73_v41 }
  0xa2   :  { %v76_v42 = vadd.s32 1, %v500_v40  ;;  %v114_v52 = vshll.u32 %v74_v44, 8 }
  0xa4   :  { %vm77_vm0 = vcmp.gt.s32.totalorder %v76_v42, 0 }
  0xa5   :  { %v78_v43 = vsel %vm77_vm0, %v76_v42, 0  ;;  %vm702_vm0 = vmmov 0  }
  0xa6   :  { %v80_v45 = vand.u32 31, %v78_v43  ;;  %v79_v46 = vshrl.u32 %v78_v43, 5 }
  0xa8   :  { %v81_v47 = vsub.s32 32, %v80_v45  ;;  %v92_v49 = vshll.u32 %v695_v48, %v80_v45  ;;  %v95_v51 = vshll.u32 %v696_v50, %v80_v45  ;;  %v83_v57 = vshll.u32 %v698_v56, %v80_v45 }
  0xa9   :  { %v86_v60 = vshll.u32 %v699_v58, %v80_v45  ;;  %v89_v63 = vshll.u32 %v700_v61, %v80_v45  ;;  %vm101_vm1 = vcmp.lt.s32.totalorder %v79_v46, 4  ;;  %vm98_vm2 = vcmp.lt.s32.totalorder %v79_v46, 1 }
  0xaa   :  { %v93_v53 = vshrl.u32 %v696_v50, %v81_v47  ;;  %v96_v55 = vshrl.u32 %v697_v54, %v81_v47  ;;  %v84_v59 = vshrl.u32 %v699_v58, %v81_v47  ;;  %v87_v62 = vshrl.u32 %v700_v61, %v81_v47 }
  0xab   :  { %v90_v0 = vshrl.u32 %v695_v48, %v81_v47  ;;  %v82_v4 = vshrl.u32 %v698_v56, %v81_v47  ;;  %vm99_vm3 = vcmp.lt.s32.totalorder %v79_v46, 2  ;;  %vm100_vm4 = vcmp.lt.s32.totalorder %v79_v46, 3 }
  0xac   :  { %v94_v1 = vor.u32 %v93_v53, %v92_v49  ;;  %v97_v2 = vor.u32 %v96_v55, %v95_v51  ;;  %v85_v3 = vor.u32 %v84_v59, %v83_v57  ;;  %v88_v5 = vor.u32 %v87_v62, %v86_v60 }
  0xad   :  { %v91_v6 = vor.u32 %v90_v0, %v89_v63 }
  0xae   :  { %v107_v7 = vsel %vm101_vm1, %v94_v1, 920167782  ;;  %v111_v8 = vsel %vm101_vm1, %v97_v2, 1326507024  ;;  %v106_v10 = vsel %vm98_vm2, %v85_v3, %v88_v5  ;;  %v102_v13 = vsel %vm98_vm2, %v82_v4, %v85_v3 }
  0xaf   :  { %v103_v9 = vsel %vm101_vm1, %v91_v6, 2102212464  ;;  %v108_v11 = vsel %vm100_vm4, %v91_v6, %v107_v7  ;;  %v110_v12 = vsel %vm98_vm2, %v88_v5, %v91_v6  ;;  %v112_v16 = vsel %vm100_vm4, %v94_v1, %v111_v8  ;;  %v404_v7 = vld [vmem:[#allocation5 + $0x78] sm:$0xff]  ;;  %v403_v8 = vld [vmem:[#allocation5 + $0x70] sm:$0xff] }
  0xb0   :  { %v104_v14 = vsel %vm100_vm4, %v88_v5, %v103_v9  ;;  %v109_v15 = vsel %vm99_vm3, %v106_v10, %v108_v11  ;;  %v113_v17 = vsel %vm99_vm3, %v110_v12, %v112_v16  ;;  %v701_v6 = vmov 0.0   ;;  %v402_v9 = vld [vmem:[#allocation5 + $0x68] sm:$0xff]  ;;  %v401_v10 = vld [vmem:[#allocation5 + $0x60] sm:$0xff]  ;;  %v399_v11 = vld [vmem:[#allocation5 + $0x50] sm:$0xff] }
  0xb1   :  { %v757_v18 = vmul.u32.u64.low %v114_v52, %v109_v15  ;;  %v758_v19 = vmul.u32.u64.high %v114_v52, %v109_v15, %v757_v18  ;;  %v760_v20 = vmul.u32.u64.low %v114_v52, %v113_v17  ;;  %v761_v21 = vmul.u32.u64.high %v114_v52, %v113_v17, %v760_v20  ;;  %562 = vmatprep.subr.mxu1 %v701_v6  ;;  %v398_v12 = vld [vmem:[#allocation5 + $0x48] sm:$0xff]  ;;  %594 = vmatprep.mubr.msk.f32.mxu1 %vm702_vm0, %v701_v6  ;;  %v395_v15 = vld [vmem:[#allocation5 + $0x30] sm:$0xff]  ;;  %v393_v17 = vld [vmem:[#allocation5 + $0x20] sm:$0xff] }
  0xb2   :  { %v105_v22 = vsel %vm99_vm3, %v102_v13, %v104_v14  ;;  %563 = vmatpush3.msra.mxu1 %v404_v7  ;;  %v397_v13 = vld [vmem:[#allocation5 + $0x40] sm:$0xff]  ;;  %v396_v14 = vld [vmem:[#allocation5 + $0x38] sm:$0xff]  ;;  %v394_v16 = vld [vmem:[#allocation5 + $0x28] sm:$0xff] }
  0xb3   :  { %v124_v23 = vadd.s32 1, %v758_v19  ;;  %v121_v24 = vmul.u32 %v114_v52, %v105_v22  ;;  %vm123_vm5 = vc.u32 %v761_v21, %v757_v18  ;;  %v122_v37 = vadd.s32 %v757_v18, %v761_v21  ;;  %564 = vmatprep.subr.mxu1 %v701_v6  ;;  %v392_v18 = vld [vmem:[#allocation5 + $0x18] sm:$0xff]  ;;  %v390_v20 = vld [vmem:[#allocation5 + $0x8] sm:$0xff]  ;;  %v389_v21 = vld [vmem:[#allocation5] sm:$0xff] }
  0xb4   :  { %565 = vmatpush3.msra.mxu1 %v403_v8 }
  0xb5   :  { %v125_v25 = vsel %vm123_vm5, %v124_v23, %v758_v19  ;;  %566 = vmatprep.subr.mxu1 %v701_v6  ;;  %v391_v19 = vld [vmem:[#allocation5 + $0x10] sm:$0xff]  ;;  %v508_v23 = vld [vmem:[%s784_s3] ss:$0 sm:$0xff]  ;;  %s664_s3 = scalar_lea.vmem %s490_s14, 128 }
  0xb6   :  { %v126_v26 = vadd.s32 %v125_v25, %v121_v24  ;;  %567 = vmatpush3.msra.mxu1 %v402_v9  ;;  %p665_p10 = scmp.ne.s32.totalorder %s490_s14, %s664_s3  ;;  %p670_p12 = scmp.lt.s32.totalorder %s664_s3, %s664_s3 }
  0xb7   :  { %568 = vmatprep.subr.mxu1 %v701_v6 }
  0xb8   :  { %v127_v27 = vadd.s32 536870912, %v126_v26  ;;  %569 = vmatpush3.msra.mxu1 %v401_v10  ;;  %p671_p13 = por %p670_p12, %p669_p11 }
  0xb9   :  { %570 = vmatprep.subr.mxu1 %v701_v6 }
  0xba   :  { %v128_v28 = vshrl.u32 %v127_v27, 30  ;;  %p672_p0 = pnand %p671_p13, %p665_p10 }
  0xbc   :  { %v129_v29 = vshll.u32 %v128_v28, 30  ;;  %v152_v51 = vsub.s32 4, %v128_v28 }
  0xbe   :  { %v130_v30 = vsub.s32 %v126_v26, %v129_v29  ;;  %v153_v54 = vsel %vm68_vm7, %v152_v51, %v128_v28 }
  0xbf   :  { %v155_v55 = vsel %vm67_vm8, 0, %v153_v54 }
  0xc0   :  { %v132_v31 = vsub.s32 0, %v130_v30  ;;  %v262_v56 = vadd.s32 3, %v155_v55  ;;  %v159_v58 = vand.u32 3, %v155_v55 }
  0xc2   :  { %v501_v32 = vmin.u32 %v132_v31, %v130_v30  ;;  %v263_v57 = vand.u32 3, %v262_v56  ;;  %vm164_vm10 = vcmp.eq.s32.totalorder %v159_v58, 2  ;;  %vm161_vm12 = vcmp.eq.s32.totalorder %v159_v58, 0 }
  0xc3   :  { %vm160_vm14 = vcmp.lt.s32.totalorder %v159_v58, 2 }
  0xc4   :  { %v134_v33 = vclz %v501_v32  ;;  %vm268_vm9 = vcmp.eq.s32.totalorder %v263_v57, 2  ;;  %vm265_vm11 = vcmp.eq.s32.totalorder %v263_v57, 0  ;;  %vm264_vm13 = vcmp.lt.s32.totalorder %v263_v57, 2 }
  0xc6   :  { %v502_v34 = vadd.s32 4294967294, %v134_v33 }
  0xc8   :  { %vm503_vm6 = vcmp.lt.s32.totalorder %v502_v34, 0 }
  0xc9   :  { %v137_v35 = vsel %vm503_vm6, 0, %v502_v34  ;;  %v509_v34 = vld [vmem:[%s786_s5] ss:$0 sm:$0xff] }
  0xca   :  { %v138_v39 = vsub.s32 32, %v137_v35  ;;  %v142_v40 = vsub.s32 4294967266, %v137_v35  ;;  %v139_v41 = vshll.u32 %v130_v30, %v137_v35 }
  0xcc   :  { %v140_v42 = vshrl.u32 %v122_v37, %v138_v39  ;;  %v143_v43 = vadd.s32 127, %v142_v40 }
  0xce   :  { %v141_v44 = vor.u32 %v140_v42, %v139_v41  ;;  %v144_v45 = vshll.u32 %v143_v43, 23 }
  0xd0   :  { %v145_v46 = vor.u32 4788187, %v144_v45  ;;  %v148_v48 = vcvt.s32.f32 %v141_v44 }
  0xd2   :  { %v146_v47 = vand.u32 2147483647, %v145_v46 }
  0xd4   :  { %v149_v49 = vmul.f32 %v148_v48, %v146_v47 }
  0xd6   :  { %v150_v50 = vxor.u32 2147483648, %v149_v49 }
  0xd8   :  { %v151_v52 = vsel %vm68_vm7, %v150_v50, %v149_v49 }
  0xd9   :  { %v154_v53 = vsel %vm67_vm8, %v751_v36, %v151_v52  ;;  %v400_v36 = vld [vmem:[#allocation5 + $0x58] sm:$0xff] }
  0xda   :  { %616 = vcosq.f32 %v154_v53  ;;  %571 = vmatpush3.msra.mxu1 %v400_v36 }
  0xdb   :  { %618 = vsinq.f32 %v154_v53  ;;  %572 = vmatprep.subr.mxu1 %v701_v6 }
  0xdc   :  { %573 = vmatpush3.msra.mxu1 %v399_v11 }
  0xdd   :  { %574 = vmatprep.subr.mxu1 %v701_v6 }
  0xde   :  { %575 = vmatpush3.msra.mxu1 %v398_v12 }
  0xdf   :  { %576 = vmatprep.subr.mxu1 %v701_v6 }
  0xe0   :  { %577 = vmatpush3.msra.mxu1 %v397_v13 }
  0xe1   :  { %578 = vmatprep.subr.mxu1 %v701_v6 }
  0xe2   :  { %579 = vmatpush3.msra.mxu1 %v396_v14 }
  0xe3   :  { %580 = vmatprep.subr.mxu1 %v701_v6 }
  0xe4   :  { %581 = vmatpush3.msra.mxu1 %v395_v15 }
  0xe5   :  { %582 = vmatprep.subr.mxu1 %v701_v6 }
  0xe6   :  { %583 = vmatpush3.msra.mxu1 %v394_v16 }
  0xe7   :  { %v617_v59 = vpop.eup %616  ;;  %584 = vmatprep.subr.mxu1 %v701_v6 }
  0xe8   :  { %v619_v60 = vpop.eup %618  ;;  %v165_v61 = vxor.u32 2147483648, %v617_v59  ;;  %585 = vmatpush3.msra.mxu1 %v393_v17 }
  0xe9   :  { %v162_v62 = vxor.u32 2147483648, %v619_v60  ;;  %586 = vmatprep.subr.mxu1 %v701_v6 }
  0xea   :  { %v270_v63 = vsel %vm268_vm9, %v165_v61, %v619_v60  ;;  %v166_v38 = vsel %vm164_vm10, %v165_v61, %v619_v60  ;;  %587 = vmatpush3.msra.mxu1 %v392_v18 }
  0xeb   :  { %v267_v0 = vsel %vm265_vm11, %v617_v59, %v162_v62  ;;  %v163_v1 = vsel %vm161_vm12, %v617_v59, %v162_v62  ;;  %588 = vmatprep.subr.mxu1 %v701_v6 }
  0xec   :  { %v271_v2 = vsel %vm264_vm13, %v267_v0, %v270_v63  ;;  %v167_v3 = vsel %vm160_vm14, %v163_v1, %v166_v38  ;;  %589 = vmatpush3.msra.mxu1 %v391_v19 }
  0xed   :  { %v272_v4 = vsel %vm158_vm15, nan, %v271_v2  ;;  %v168_v5 = vsel %vm158_vm15, nan, %v167_v3  ;;  %590 = vmatprep.subr.mxu1 %v701_v6 }
  0xee   :  { %376 = vmatprep.mubr.f32.mxu0 %v272_v4  ;;  %591 = vmatpush3.msra.mxu1 %v390_v20 }
  0xef   :  { %377 = vmatmul.mubr.f32.vlgmr.msra.gmra.mxu0 %v168_v5  ;;  %592 = vmatprep.subr.mxu1 %v701_v6 }
  0xf0   :  { %593 = vmatpush3.msra.mxu1 %v389_v21 }
 0x1af   :  { %v542_v22 = vpop.f32.mrf.mxu0 }
 0x1b1   :  { %v543_v24 = vpop.f32.mrf.mxu0 }
 0x1b2   :  { %v544_v25 = vadd.f32 %v543_v24, %v542_v22 }
 0x1b4   :  { %v379_v26 = vadd.f32 %v544_v25, %v508_v23 }
 0x1b6   :  { %v382_v27 = vsub.f32 0.0, %v379_v26 }
 0x1b8   :  { %v383_v28 = vmin.f32 %v382_v27, 80.0 }
 0x1ba   :  { %v384_v29 = vmul.f32 1.442695, %v383_v28 }
 0x1bc   :  { %620 = vpow2.f32 %v384_v29 }
 0x1c9   :  { %v621_v30 = vpop.eup %620 }
 0x1ca   :  { %v386_v31 = vadd.f32 1.0, %v621_v30 }
 0x1cc   :  { %622 = vrcp.f32 %v386_v31 }
 0x1d9   :  { %v623_v32 = vpop.eup %622 }
 0x1da   :  { %v388_v33 = vmul.f32 %v623_v32, %v379_v26 }
 0x1dc   :  { %595 = vmatmul.mubr.f32.vlgmr.msra.gmra.mxu1 %v388_v33 }
 0x29c   :  { %v478_v35 = vpop.f32.mrf.mxu1 }
 0x29d   :  { %v479_v37 = vadd.f32 %v509_v34, %v478_v35 }
 0x29e   :  { %v596_v39 = vpop.f32.mrf.mxu1 }
 0x29f   :  { %482 = vst [vmem:[#allocation7] sm:$0xff] %v479_v37 }
 0x2a0   :  { %675 = shalt.err (!%p672_p0)
}
 0x2a1   :  { %492 = dma.vmem_to_hbm [thread:$0]  %s490_s14, 128, %s787_s6, [#allocation4]  }
 0x2a2   :  { %688 = dma.done.wait [#allocation4], 128  }
 0x2a3   :  { %689 = vsyncadd [#allocation4], 4294967168 }
 0x2a4   :  { %496 = vsyncpa [#allocation3], 1 }
 0x2a5   :  { %497 = vsyncpa [#allocation6], 1 }
 0x2a6   :  { %498 = vsyncpa [#allocation4], 1 }

// kernel: tpu_custom_call.1
= control target key start
LH: loop header
LB: loop body
LE: loop exit
PB: predicated region body
PF: predicated region fallthrough
CT: control target
= control target key end

     0   :  { %11 = vsyncpa [#allocation3], 0  ;;  %s781_s0 = inlined_call_operand.vmem [shape: f32[8,1], index: 0, kind: input, shape index: {}]   ;;  %s782_s1 = inlined_call_operand.vmem [shape: f32[1,128], index: 1, kind: input, shape index: {}]   ;;  %s783_s2 = inlined_call_operand.hbm [shape: f32[256,128], index: 2, kind: input, shape index: {}]   ;;  %s784_s3 = inlined_call_operand.vmem [shape: f32[1,128], index: 3, kind: input, shape index: {}]   ;;  %s785_s4 = inlined_call_operand.hbm [shape: f32[128,128], index: 4, kind: input, shape index: {}]   ;;  %s786_s5 = inlined_call_operand.vmem [shape: f32[1,128], index: 5, kind: input, shape index: {}]   ;;  %s787_s6 = inlined_call_operand.hbm [shape: f32[8,128], index: 6, kind: output, shape index: {}]  }
   0x1   :  { %12 = vsyncpa [#allocation6], 0 }
   0x2   :  { %13 = vsyncpa [#allocation4], 0  ;;  %s690_s21 = smov [#allocation2]  }
   0x3   :  { %s23_s22 = sshll.u32 %s690_s21, 4  ;;  %s24_s22 = int_to_ptr.vmem [resolvable:$true] %s23_s22 }
   0x4   :  { %s632_s23 = scalar_lea.vmem %s24_s22, 4096  ;;  %p637_p1 = scmp.lt.s32.totalorder %s24_s22, %s24_s22 }
   0x5   :  { %p633_p0 = scmp.ne.s32.totalorder %s24_s22, %s632_s23  ;;  %p638_p2 = scmp.lt.s32.totalorder %s632_s23, %s632_s23 }
   0x7   :  { %p639_p3 = por %p638_p2, %p637_p1 }
   0x9   :  { %p640_p4 = pnand %p639_p3, %p633_p0 }
   0xb   :  { %643 = shalt.err (!%p640_p4)
}
   0xc   :  { %s691_s24 = smov 128   ;;  %s692_s25 = smov 8  }
   0xd   :  { %29 = dma.hbm_to_vmem [thread:$0]  %s783_s2, 4096, %s24_s22, [#allocation3], %s691_s24, %s691_s24, %s692_s25  }
   0xe   :  { %s693_s28 = smov [#allocation5]  }
   0xf   :  { %s37_s29 = sshll.u32 %s693_s28, 4  ;;  %s38_s29 = int_to_ptr.vmem [resolvable:$true] %s37_s29 }
  0x10   :  { %s652_s30 = scalar_lea.vmem %s38_s29, 2048  ;;  %p657_p6 = scmp.lt.s32.totalorder %s38_s29, %s38_s29 }
  0x11   :  { %p653_p5 = scmp.ne.s32.totalorder %s38_s29, %s652_s30  ;;  %p658_p7 = scmp.lt.s32.totalorder %s652_s30, %s652_s30 }
  0x13   :  { %p659_p8 = por %p658_p7, %p657_p6 }
  0x15   :  { %p660_p9 = pnand %p659_p8, %p653_p5 }
  0x17   :  { %663 = shalt.err (!%p660_p9)
}
  0x18   :  { %43 = dma.hbm_to_vmem [thread:$0]  %s785_s4, 2048, %s38_s29, [#allocation6], %s691_s24, %s691_s24, %s692_s25  }
  0x19   :  { %684 = dma.done.wait [#allocation3], 4096  }
  0x1a   :  { %685 = vsyncadd [#allocation3], 4294963200 }
  0x1b   :  { %686 = dma.done.wait [#allocation6], 2048  }
  0x1c   :  { %687 = vsyncadd [#allocation6], 4294965248  ;;  %v694_v0 = vmov 0   ;;  %v52_v1 = vld [vmem:[%s781_s0] sm:$0xff]  ;;  %v304_v2 = vld [vmem:[#allocation2 + $0xf8] sm:$0xff]  ;;  %s703_s13 = smov [#allocation7]  }
  0x1d   :  { %615 = vset.pattern.permute.xlu0 %v694_v0  ;;  %v288_v3 = vld [vmem:[#allocation2 + $0x78] sm:$0xff]  ;;  %v303_v4 = vld [vmem:[#allocation2 + $0xf0] sm:$0xff]  ;;  %510 = vmatprep.subr.mxu0 %v304_v2  ;;  %v302_v6 = vld [vmem:[#allocation2 + $0xe8] sm:$0xff]  ;;  %v695_v48 = vmov 2102212464   ;;  %s489_s14 = sshll.u32 %s703_s13, 4  ;;  %s490_s14 = int_to_ptr.vmem [resolvable:$true] %s489_s14 }
  0x1e   :  { %56 = vperm.xlu0 %615, %v52_v1   ;;  %v287_v5 = vld [vmem:[#allocation2 + $0x70] sm:$0xff]  ;;  %511 = vmatpush3.msra.mxu0 %v288_v3  ;;  %v286_v7 = vld [vmem:[#allocation2 + $0x68] sm:$0xff]  ;;  %v301_v8 = vld [vmem:[#allocation2 + $0xe0] sm:$0xff]  ;;  %v696_v50 = vmov 920167782   ;;  %p669_p11 = scmp.lt.s32.totalorder %s490_s14, %s490_s14 }
  0x1f   :  { %512 = vmatprep.subr.mxu0 %v303_v4  ;;  %v285_v9 = vld [vmem:[#allocation2 + $0x60] sm:$0xff]  ;;  %v300_v10 = vld [vmem:[#allocation2 + $0xd8] sm:$0xff]  ;;  %v299_v12 = vld [vmem:[#allocation2 + $0xd0] sm:$0xff]  ;;  %v697_v54 = vmov 1326507024  }
  0x20   :  { %513 = vmatpush3.msra.mxu0 %v287_v5  ;;  %v284_v11 = vld [vmem:[#allocation2 + $0x58] sm:$0xff]  ;;  %v283_v13 = vld [vmem:[#allocation2 + $0x50] sm:$0xff]  ;;  %v298_v14 = vld [vmem:[#allocation2 + $0xc8] sm:$0xff]  ;;  %v698_v56 = vmov 683565275  }
  0x21   :  { %514 = vmatprep.subr.mxu0 %v302_v6  ;;  %v282_v15 = vld [vmem:[#allocation2 + $0x48] sm:$0xff]  ;;  %v297_v16 = vld [vmem:[#allocation2 + $0xc0] sm:$0xff]  ;;  %v296_v18 = vld [vmem:[#allocation2 + $0xb8] sm:$0xff]  ;;  %v699_v58 = vmov 2475754826  }
  0x22   :  { %515 = vmatpush3.msra.mxu0 %v286_v7  ;;  %v281_v17 = vld [vmem:[#allocation2 + $0x40] sm:$0xff]  ;;  %v280_v19 = vld [vmem:[#allocation2 + $0x38] sm:$0xff]  ;;  %v295_v20 = vld [vmem:[#allocation2 + $0xb0] sm:$0xff]  ;;  %v700_v61 = vmov 2131351028  }
  0x23   :  { %516 = vmatprep.subr.mxu0 %v301_v8  ;;  %v279_v21 = vld [vmem:[#allocation2 + $0x30] sm:$0xff]  ;;  %v294_v22 = vld [vmem:[#allocation2 + $0xa8] sm:$0xff]  ;;  %v293_v24 = vld [vmem:[#allocation2 + $0xa0] sm:$0xff] }
  0x24   :  { %517 = vmatpush3.msra.mxu0 %v285_v9  ;;  %v278_v23 = vld [vmem:[#allocation2 + $0x28] sm:$0xff]  ;;  %v277_v25 = vld [vmem:[#allocation2 + $0x20] sm:$0xff]  ;;  %v292_v26 = vld [vmem:[#allocation2 + $0x98] sm:$0xff] }
  0x25   :  { %518 = vmatprep.subr.mxu0 %v300_v10  ;;  %v276_v27 = vld [vmem:[#allocation2 + $0x18] sm:$0xff]  ;;  %v291_v28 = vld [vmem:[#allocation2 + $0x90] sm:$0xff]  ;;  %v290_v30 = vld [vmem:[#allocation2 + $0x88] sm:$0xff] }
  0x26   :  { %519 = vmatpush3.msra.mxu0 %v284_v11  ;;  %v275_v29 = vld [vmem:[#allocation2 + $0x10] sm:$0xff]  ;;  %v274_v31 = vld [vmem:[#allocation2 + $0x8] sm:$0xff]  ;;  %v289_v32 = vld [vmem:[#allocation2 + $0x80] sm:$0xff] }
  0x27   :  { %520 = vmatprep.subr.mxu0 %v299_v12  ;;  %v273_v33 = vld [vmem:[#allocation2] sm:$0xff] }
  0x28   :  { %521 = vmatpush3.msra.mxu0 %v283_v13  ;;  %v499_v34 = vld [vmem:[%s782_s1] ss:$0 sm:$0xff] }
  0x29   :  { %522 = vmatprep.subr.mxu0 %v298_v14 }
  0x2a   :  { %523 = vmatpush3.msra.mxu0 %v282_v15 }
  0x2b   :  { %524 = vmatprep.subr.mxu0 %v297_v16 }
  0x2c   :  { %525 = vmatpush3.msra.mxu0 %v281_v17 }
  0x2d   :  { %526 = vmatprep.subr.mxu0 %v296_v18 }
  0x2e   :  { %527 = vmatpush3.msra.mxu0 %v280_v19 }
  0x2f   :  { %528 = vmatprep.subr.mxu0 %v295_v20 }
  0x30   :  { %529 = vmatpush3.msra.mxu0 %v279_v21 }
  0x31   :  { %530 = vmatprep.subr.mxu0 %v294_v22 }
  0x32   :  { %531 = vmatpush3.msra.mxu0 %v278_v23 }
  0x33   :  { %532 = vmatprep.subr.mxu0 %v293_v24 }
  0x34   :  { %533 = vmatpush3.msra.mxu0 %v277_v25 }
  0x35   :  { %534 = vmatprep.subr.mxu0 %v292_v26 }
  0x36   :  { %535 = vmatpush3.msra.mxu0 %v276_v27 }
  0x37   :  { %536 = vmatprep.subr.mxu0 %v291_v28 }
  0x38   :  { %537 = vmatpush3.msra.mxu0 %v275_v29 }
  0x39   :  { %538 = vmatprep.subr.mxu0 %v290_v30 }
  0x3a   :  { %539 = vmatpush3.msra.mxu0 %v274_v31 }
  0x3b   :  { %540 = vmatprep.subr.mxu0 %v289_v32 }
  0x3c   :  { %541 = vmatpush3.msra.mxu0 %v273_v33 }
  0x99   :  { %v57_v35 = vpop.permute.xlu0 %56 }
  0x9a   :  { %v751_v36 = vmul.f32 %v499_v34, %v57_v35 }
  0x9c   :  { %v69_v37 = vand.u32 2139095040, %v751_v36  ;;  %v66_v38 = vand.u32 2147483647, %v751_v36  ;;  %vm68_vm7 = vcmp.lt.s32.totalorder %v751_v36, 0  ;;  %vm158_vm15 = vweird.f32 %v751_v36 }
  0x9e   :  { %v70_v39 = vshrl.u32 %v69_v37, 23  ;;  %v73_v41 = vand.u32 8388607, %v66_v38  ;;  %vm67_vm8 = vcmp.le.f32.partialorder %v66_v38, 0.7853982 }
  0xa0   :  { %v500_v40 = vadd.s32 4294967169, %v70_v39  ;;  %v74_v44 = vor.u32 8388608, %v73_v41 }
  0xa2   :  { %v76_v42 = vadd.s32 1, %v500_v40  ;;  %v114_v52 = vshll.u32 %v74_v44, 8 }
  0xa4   :  { %vm77_vm0 = vcmp.gt.s32.totalorder %v76_v42, 0 }
  0xa5   :  { %v78_v43 = vsel %vm77_vm0, %v76_v42, 0  ;;  %vm702_vm0 = vmmov 0  }
  0xa6   :  { %v80_v45 = vand.u32 31, %v78_v43  ;;  %v79_v46 = vshrl.u32 %v78_v43, 5 }
  0xa8   :  { %v81_v47 = vsub.s32 32, %v80_v45  ;;  %v92_v49 = vshll.u32 %v695_v48, %v80_v45  ;;  %v95_v51 = vshll.u32 %v696_v50, %v80_v45  ;;  %v83_v57 = vshll.u32 %v698_v56, %v80_v45 }
  0xa9   :  { %v86_v60 = vshll.u32 %v699_v58, %v80_v45  ;;  %v89_v63 = vshll.u32 %v700_v61, %v80_v45  ;;  %vm101_vm1 = vcmp.lt.s32.totalorder %v79_v46, 4  ;;  %vm98_vm2 = vcmp.lt.s32.totalorder %v79_v46, 1 }
  0xaa   :  { %v93_v53 = vshrl.u32 %v696_v50, %v81_v47  ;;  %v96_v55 = vshrl.u32 %v697_v54, %v81_v47  ;;  %v84_v59 = vshrl.u32 %v699_v58, %v81_v47  ;;  %v87_v62 = vshrl.u32 %v700_v61, %v81_v47 }
  0xab   :  { %v90_v0 = vshrl.u32 %v695_v48, %v81_v47  ;;  %v82_v4 = vshrl.u32 %v698_v56, %v81_v47  ;;  %vm99_vm3 = vcmp.lt.s32.totalorder %v79_v46, 2  ;;  %vm100_vm4 = vcmp.lt.s32.totalorder %v79_v46, 3 }
  0xac   :  { %v94_v1 = vor.u32 %v93_v53, %v92_v49  ;;  %v97_v2 = vor.u32 %v96_v55, %v95_v51  ;;  %v85_v3 = vor.u32 %v84_v59, %v83_v57  ;;  %v88_v5 = vor.u32 %v87_v62, %v86_v60 }
  0xad   :  { %v91_v6 = vor.u32 %v90_v0, %v89_v63 }
  0xae   :  { %v107_v7 = vsel %vm101_vm1, %v94_v1, 920167782  ;;  %v111_v8 = vsel %vm101_vm1, %v97_v2, 1326507024  ;;  %v106_v10 = vsel %vm98_vm2, %v85_v3, %v88_v5  ;;  %v102_v13 = vsel %vm98_vm2, %v82_v4, %v85_v3 }
  0xaf   :  { %v103_v9 = vsel %vm101_vm1, %v91_v6, 2102212464  ;;  %v108_v11 = vsel %vm100_vm4, %v91_v6, %v107_v7  ;;  %v110_v12 = vsel %vm98_vm2, %v88_v5, %v91_v6  ;;  %v112_v16 = vsel %vm100_vm4, %v94_v1, %v111_v8  ;;  %v404_v7 = vld [vmem:[#allocation5 + $0x78] sm:$0xff]  ;;  %v403_v8 = vld [vmem:[#allocation5 + $0x70] sm:$0xff] }
  0xb0   :  { %v104_v14 = vsel %vm100_vm4, %v88_v5, %v103_v9  ;;  %v109_v15 = vsel %vm99_vm3, %v106_v10, %v108_v11  ;;  %v113_v17 = vsel %vm99_vm3, %v110_v12, %v112_v16  ;;  %v701_v6 = vmov 0.0   ;;  %v402_v9 = vld [vmem:[#allocation5 + $0x68] sm:$0xff]  ;;  %v401_v10 = vld [vmem:[#allocation5 + $0x60] sm:$0xff]  ;;  %v399_v11 = vld [vmem:[#allocation5 + $0x50] sm:$0xff] }
  0xb1   :  { %v757_v18 = vmul.u32.u64.low %v114_v52, %v109_v15  ;;  %v758_v19 = vmul.u32.u64.high %v114_v52, %v109_v15, %v757_v18  ;;  %v760_v20 = vmul.u32.u64.low %v114_v52, %v113_v17  ;;  %v761_v21 = vmul.u32.u64.high %v114_v52, %v113_v17, %v760_v20  ;;  %562 = vmatprep.subr.mxu1 %v701_v6  ;;  %v398_v12 = vld [vmem:[#allocation5 + $0x48] sm:$0xff]  ;;  %594 = vmatprep.mubr.msk.f32.mxu1 %vm702_vm0, %v701_v6  ;;  %v395_v15 = vld [vmem:[#allocation5 + $0x30] sm:$0xff]  ;;  %v393_v17 = vld [vmem:[#allocation5 + $0x20] sm:$0xff] }
  0xb2   :  { %v105_v22 = vsel %vm99_vm3, %v102_v13, %v104_v14  ;;  %563 = vmatpush3.msra.mxu1 %v404_v7  ;;  %v397_v13 = vld [vmem:[#allocation5 + $0x40] sm:$0xff]  ;;  %v396_v14 = vld [vmem:[#allocation5 + $0x38] sm:$0xff]  ;;  %v394_v16 = vld [vmem:[#allocation5 + $0x28] sm:$0xff] }
  0xb3   :  { %v124_v23 = vadd.s32 1, %v758_v19  ;;  %v121_v24 = vmul.u32 %v114_v52, %v105_v22  ;;  %vm123_vm5 = vc.u32 %v761_v21, %v757_v18  ;;  %v122_v37 = vadd.s32 %v757_v18, %v761_v21  ;;  %564 = vmatprep.subr.mxu1 %v701_v6  ;;  %v392_v18 = vld [vmem:[#allocation5 + $0x18] sm:$0xff]  ;;  %v390_v20 = vld [vmem:[#allocation5 + $0x8] sm:$0xff]  ;;  %v389_v21 = vld [vmem:[#allocation5] sm:$0xff] }
  0xb4   :  { %565 = vmatpush3.msra.mxu1 %v403_v8 }
  0xb5   :  { %v125_v25 = vsel %vm123_vm5, %v124_v23, %v758_v19  ;;  %566 = vmatprep.subr.mxu1 %v701_v6  ;;  %v391_v19 = vld [vmem:[#allocation5 + $0x10] sm:$0xff]  ;;  %v508_v23 = vld [vmem:[%s784_s3] ss:$0 sm:$0xff]  ;;  %s664_s3 = scalar_lea.vmem %s490_s14, 128 }
  0xb6   :  { %v126_v26 = vadd.s32 %v125_v25, %v121_v24  ;;  %567 = vmatpush3.msra.mxu1 %v402_v9  ;;  %p665_p10 = scmp.ne.s32.totalorder %s490_s14, %s664_s3  ;;  %p670_p12 = scmp.lt.s32.totalorder %s664_s3, %s664_s3 }
  0xb7   :  { %568 = vmatprep.subr.mxu1 %v701_v6 }
  0xb8   :  { %v127_v27 = vadd.s32 536870912, %v126_v26  ;;  %569 = vmatpush3.msra.mxu1 %v401_v10  ;;  %p671_p13 = por %p670_p12, %p669_p11 }
  0xb9   :  { %570 = vmatprep.subr.mxu1 %v701_v6 }
  0xba   :  { %v128_v28 = vshrl.u32 %v127_v27, 30  ;;  %p672_p0 = pnand %p671_p13, %p665_p10 }
  0xbc   :  { %v129_v29 = vshll.u32 %v128_v28, 30  ;;  %v152_v51 = vsub.s32 4, %v128_v28 }
  0xbe   :  { %v130_v30 = vsub.s32 %v126_v26, %v129_v29  ;;  %v153_v54 = vsel %vm68_vm7, %v152_v51, %v128_v28 }
  0xbf   :  { %v155_v55 = vsel %vm67_vm8, 0, %v153_v54 }
  0xc0   :  { %v132_v31 = vsub.s32 0, %v130_v30  ;;  %v262_v56 = vadd.s32 3, %v155_v55  ;;  %v159_v58 = vand.u32 3, %v155_v55 }
  0xc2   :  { %v501_v32 = vmin.u32 %v132_v31, %v130_v30  ;;  %v263_v57 = vand.u32 3, %v262_v56  ;;  %vm164_vm10 = vcmp.eq.s32.totalorder %v159_v58, 2  ;;  %vm161_vm12 = vcmp.eq.s32.totalorder %v159_v58, 0 }
  0xc3   :  { %vm160_vm14 = vcmp.lt.s32.totalorder %v159_v58, 2 }
  0xc4   :  { %v134_v33 = vclz %v501_v32  ;;  %vm268_vm9 = vcmp.eq.s32.totalorder %v263_v57, 2  ;;  %vm265_vm11 = vcmp.eq.s32.totalorder %v263_v57, 0  ;;  %vm264_vm13 = vcmp.lt.s32.totalorder %v263_v57, 2 }
  0xc6   :  { %v502_v34 = vadd.s32 4294967294, %v134_v33 }
  0xc8   :  { %vm503_vm6 = vcmp.lt.s32.totalorder %v502_v34, 0 }
  0xc9   :  { %v137_v35 = vsel %vm503_vm6, 0, %v502_v34  ;;  %v509_v34 = vld [vmem:[%s786_s5] ss:$0 sm:$0xff] }
  0xca   :  { %v138_v39 = vsub.s32 32, %v137_v35  ;;  %v142_v40 = vsub.s32 4294967266, %v137_v35  ;;  %v139_v41 = vshll.u32 %v130_v30, %v137_v35 }
  0xcc   :  { %v140_v42 = vshrl.u32 %v122_v37, %v138_v39  ;;  %v143_v43 = vadd.s32 127, %v142_v40 }
  0xce   :  { %v141_v44 = vor.u32 %v140_v42, %v139_v41  ;;  %v144_v45 = vshll.u32 %v143_v43, 23 }
  0xd0   :  { %v145_v46 = vor.u32 4788187, %v144_v45  ;;  %v148_v48 = vcvt.s32.f32 %v141_v44 }
  0xd2   :  { %v146_v47 = vand.u32 2147483647, %v145_v46 }
  0xd4   :  { %v149_v49 = vmul.f32 %v148_v48, %v146_v47 }
  0xd6   :  { %v150_v50 = vxor.u32 2147483648, %v149_v49 }
  0xd8   :  { %v151_v52 = vsel %vm68_vm7, %v150_v50, %v149_v49 }
  0xd9   :  { %v154_v53 = vsel %vm67_vm8, %v751_v36, %v151_v52  ;;  %v400_v36 = vld [vmem:[#allocation5 + $0x58] sm:$0xff] }
  0xda   :  { %616 = vcosq.f32 %v154_v53  ;;  %571 = vmatpush3.msra.mxu1 %v400_v36 }
  0xdb   :  { %618 = vsinq.f32 %v154_v53  ;;  %572 = vmatprep.subr.mxu1 %v701_v6 }
  0xdc   :  { %573 = vmatpush3.msra.mxu1 %v399_v11 }
  0xdd   :  { %574 = vmatprep.subr.mxu1 %v701_v6 }
  0xde   :  { %575 = vmatpush3.msra.mxu1 %v398_v12 }
  0xdf   :  { %576 = vmatprep.subr.mxu1 %v701_v6 }
  0xe0   :  { %577 = vmatpush3.msra.mxu1 %v397_v13 }
  0xe1   :  { %578 = vmatprep.subr.mxu1 %v701_v6 }
  0xe2   :  { %579 = vmatpush3.msra.mxu1 %v396_v14 }
  0xe3   :  { %580 = vmatprep.subr.mxu1 %v701_v6 }
  0xe4   :  { %581 = vmatpush3.msra.mxu1 %v395_v15 }
  0xe5   :  { %582 = vmatprep.subr.mxu1 %v701_v6 }
  0xe6   :  { %583 = vmatpush3.msra.mxu1 %v394_v16 }
  0xe7   :  { %v617_v59 = vpop.eup %616  ;;  %584 = vmatprep.subr.mxu1 %v701_v6 }
  0xe8   :  { %v619_v60 = vpop.eup %618  ;;  %v165_v61 = vxor.u32 2147483648, %v617_v59  ;;  %585 = vmatpush3.msra.mxu1 %v393_v17 }
  0xe9   :  { %v162_v62 = vxor.u32 2147483648, %v619_v60  ;;  %586 = vmatprep.subr.mxu1 %v701_v6 }
  0xea   :  { %v270_v63 = vsel %vm268_vm9, %v165_v61, %v619_v60  ;;  %v166_v38 = vsel %vm164_vm10, %v165_v61, %v619_v60  ;;  %587 = vmatpush3.msra.mxu1 %v392_v18 }
  0xeb   :  { %v267_v0 = vsel %vm265_vm11, %v617_v59, %v162_v62  ;;  %v163_v1 = vsel %vm161_vm12, %v617_v59, %v162_v62  ;;  %588 = vmatprep.subr.mxu1 %v701_v6 }
  0xec   :  { %v271_v2 = vsel %vm264_vm13, %v267_v0, %v270_v63  ;;  %v167_v3 = vsel %vm160_vm14, %v163_v1, %v166_v38  ;;  %589 = vmatpush3.msra.mxu1 %v391_v19 }
  0xed   :  { %v272_v4 = vsel %vm158_vm15, nan, %v271_v2  ;;  %v168_v5 = vsel %vm158_vm15, nan, %v167_v3  ;;  %590 = vmatprep.subr.mxu1 %v701_v6 }
  0xee   :  { %376 = vmatprep.mubr.f32.mxu0 %v272_v4  ;;  %591 = vmatpush3.msra.mxu1 %v390_v20 }
  0xef   :  { %377 = vmatmul.mubr.f32.vlgmr.msra.gmra.mxu0 %v168_v5  ;;  %592 = vmatprep.subr.mxu1 %v701_v6 }
  0xf0   :  { %593 = vmatpush3.msra.mxu1 %v389_v21 }
 0x1af   :  { %v542_v22 = vpop.f32.mrf.mxu0 }
 0x1b1   :  { %v543_v24 = vpop.f32.mrf.mxu0 }
 0x1b2   :  { %v544_v25 = vadd.f32 %v543_v24, %v542_v22 }
 0x1b4   :  { %v379_v26 = vadd.f32 %v544_v25, %v508_v23 }
 0x1b6   :  { %v382_v27 = vsub.f32 0.0, %v379_v26 }
 0x1b8   :  { %v383_v28 = vmin.f32 %v382_v27, 80.0 }
 0x1ba   :  { %v384_v29 = vmul.f32 1.442695, %v383_v28 }
 0x1bc   :  { %620 = vpow2.f32 %v384_v29 }
 0x1c9   :  { %v621_v30 = vpop.eup %620 }
 0x1ca   :  { %v386_v31 = vadd.f32 1.0, %v621_v30 }
 0x1cc   :  { %622 = vrcp.f32 %v386_v31 }
 0x1d9   :  { %v623_v32 = vpop.eup %622 }
 0x1da   :  { %v388_v33 = vmul.f32 %v623_v32, %v379_v26 }
 0x1dc   :  { %595 = vmatmul.mubr.f32.vlgmr.msra.gmra.mxu1 %v388_v33 }
 0x29c   :  { %v478_v35 = vpop.f32.mrf.mxu1 }
 0x29d   :  { %v479_v37 = vadd.f32 %v509_v34, %v478_v35 }
 0x29e   :  { %v596_v39 = vpop.f32.mrf.mxu1 }
 0x29f   :  { %482 = vst [vmem:[#allocation7] sm:$0xff] %v479_v37 }
 0x2a0   :  { %675 = shalt.err (!%p672_p0)
}
 0x2a1   :  { %492 = dma.vmem_to_hbm [thread:$0]  %s490_s14, 128, %s787_s6, [#allocation4]  }
 0x2a2   :  { %688 = dma.done.wait [#allocation4], 128  }
 0x2a3   :  { %689 = vsyncadd [#allocation4], 4294967168 }
 0x2a4   :  { %496 = vsyncpa [#allocation3], 1 }
 0x2a5   :  { %497 = vsyncpa [#allocation6], 1 }
 0x2a6   :  { %498 = vsyncpa [#allocation4], 1 }

</bundles_post_ra>
